<compile_context>
chip_gen: v7x
topology: tpu7x:2x2x1
jax: 0.10.0
libtpu: 0.0.40
codegen_flags: <defaults>
</compile_context>

<pallas_src>
import functools

import jax
import jax.numpy as jnp
import numpy as np
from jax.experimental import pallas as pl
from jax.experimental.pallas import tpu as pltpu


def _bottleneck_kernel(wb_ref, x_ref, o_ref, *, W, HW, C, ipb, act, activation):
    """One grid step: `ipb` complete images packed along the sublane axis.

    wb_ref : (10,) f32 SMEM (scalar prefetch) -> [w00..w22, bias]
    x_ref  : (1, ipb*C, HWp) VMEM
    o_ref  : (1, ipb*C, HWp) VMEM
    """
    # Read the 10 scalars once up front (cheap sld reads; no re-reads per tap,
    # no sst->sld forwarding hazards around the tile DMA waits).
    w = [wb_ref[k] for k in range(9)]
    bias = wb_ref[9]

    x = x_ref[...].astype(jnp.float32)                  # (1, RC, HWp)
    _, RC, HWp = x.shape

    # ---- boundary masks (tiny (1,1,HWp), shared by every tap) --------------
    lane = jax.lax.broadcasted_iota(jnp.int32, (1, 1, HWp), 2)   # p = h*W + w
    col = lane % W
    left_ok = col >= 1                 # source column w-1 exists
    right_ok = col <= W - 2            # source column w+1 exists
    up_ok = lane >= W                  # source row h-1 exists
    down_ok = lane < HW - W            # source row h+1 exists (real HW, not pad)

    # ---- 3x3 stencil via lane rolls (XLU) + zero-padding masks -------------
    # jnp.roll semantics: out[p] = in[(p - shift) % n].
    x_left = jnp.where(left_ok, pltpu.roll(x, 1, axis=2), 0.0)          # x[p-1]
    x_right = jnp.where(right_ok, pltpu.roll(x, HWp - 1, axis=2), 0.0)  # x[p+1]

    def hrow(ky):
        # 1x3 horizontal combination with kernel row `ky`, at the source row.
        return w[3 * ky] * x_left + w[3 * ky + 1] * x + w[3 * ky + 2] * x_right

    # Accumulate each row contribution immediately: only one row temporary is
    # live at a time (live full-size arrays: x, x_left, x_right, acc, r).
    acc = hrow(1)                                                    # dy = 0
    r = hrow(0)                                                      # dy = -1
    acc = acc + jnp.where(up_ok, pltpu.roll(r, W, axis=2), 0.0)
    r = hrow(2)                                                      # dy = +1
    acc = acc + jnp.where(down_ok, pltpu.roll(r, HWp - W, axis=2), 0.0)

    # ---- per-image channel max (+ bias), sublane-packing aware -------------
    if ipb == 1:
        m_full = jnp.max(x, axis=1, keepdims=True) + bias            # (1,1,HWp)
        y = acc + m_full
    else:
        parts = []
        for g in range(ipb):                       # static, small unrolled loop
            xg = x[:, g * C:(g + 1) * C, :]                          # (1,C,HWp)
            mg = jnp.max(xg, axis=1, keepdims=True) + bias           # (1,1,HWp)
            parts.append(jnp.broadcast_to(mg, (1, C, HWp)))
        y = acc + jnp.concatenate(parts, axis=1)                     # (1,RC,HWp)

    if act:
        if activation == "relu":
            y = jnp.maximum(y, 0.0)
        elif activation == "lrelu":
            y = jnp.where(y > 0, y, 0.01 * y)
        elif activation == "tanh":
            # TODO(synk): EUP tanh may differ from XLA tanh beyond 1e-5; verify
            # tolerances before relying on this branch.
            y = jnp.tanh(y)

    o_ref[...] = y.astype(o_ref.dtype)


def _pick_images_per_block(B, C, per_image_bytes,
                           target_tile_bytes=2 << 20,
                           max_tile_bytes=3 << 20):
    """Choose how many complete images one grid step owns.

    Priorities (per perf review):
      1. tile <= ~3 MiB so the ~10x live-intermediate footprint stays inside
         the 32 MiB scoped VMEM we request (v7x-safe),
      2. enough grid steps for pipeline overlap / megacore, but only when the
         whole problem is big enough for that to matter,
      3. fill the 8-sublane vregs (ipb*C multiple of 8 when C < 8),
      4. tile size near ~2 MiB to amortize the ~0.35us per-step overhead.
    """
    divisors = [d for d in range(1, B + 1) if B % d == 0]
    feasible = [d for d in divisors if d * per_image_bytes <= max_tile_bytes]
    if not feasible:
        feasible = [1]

    total_bytes = B * per_image_bytes
    if total_bytes >= 4 * target_tile_bytes:
        want_steps = 4
    elif total_bytes >= 2 * (1 << 20):
        want_steps = 2
    else:
        want_steps = 1   # tiny problem: pipelining / megacore buys nothing

    def score(d):
        steps = B // d
        rows = d * C
        sublane_eff = rows / (((rows + 7) // 8) * 8)
        tile = d * per_image_bytes
        return (min(steps, want_steps), sublane_eff, -abs(tile - target_tile_bytes))

    return max(feasible, key=score)


def bottleneck_block(x, weight, bias, *, act=True, activation="relu"):
    """x: (B, C, H, W) f32; weight: (3, 3); bias: (1,)."""
    B, C, H, W = x.shape
    HW = H * W
    HWp = ((HW + 127) // 128) * 128          # lane-dense stores need 128-multiples

    xf = x.reshape(B, C, HW)
    if HWp != HW:
        xf = jnp.pad(xf, ((0, 0), (0, 0), (0, HWp - HW)))

    per_image_bytes = C * HWp * xf.dtype.itemsize
    ipb = _pick_images_per_block(B, C, per_image_bytes)
    NB, RC = B // ipb, ipb * C
    # TODO(synk): for NB == 1 with large C*HW, add a second 'parallel' grid
    # axis over channel groups (channel-max precomputed) to use both v7x cores.
    xp = xf.reshape(NB, RC, HWp)             # image-major sublane packing (free)

    wb = jnp.concatenate([weight.reshape(9).astype(jnp.float32),
                          bias.reshape(1).astype(jnp.float32)])

    kernel = functools.partial(_bottleneck_kernel, W=W, HW=HW, C=C, ipb=ipb,
                               act=act, activation=activation)

    tile_bytes = per_image_bytes * ipb
    x_spec_kwargs = {}
    # Deeper input buffering only once there are enough steps to overlap and
    # the extra buffer still fits comfortably in VMEM.
    if NB >= 4 and tile_bytes <= (1 << 20):
        x_spec_kwargs["pipeline_mode"] = pl.Buffered(3)
    x_spec = pl.BlockSpec((1, RC, HWp), lambda i, wb: (i, 0, 0), **x_spec_kwargs)
    out_spec = pl.BlockSpec((1, RC, HWp), lambda i, wb: (i, 0, 0))

    out = pl.pallas_call(
        kernel,
        out_shape=jax.ShapeDtypeStruct((NB, RC, HWp), x.dtype),
        grid_spec=pltpu.PrefetchScalarGridSpec(
            num_scalar_prefetch=1,
            grid=(NB,),
            in_specs=[x_spec],
            out_specs=out_spec,
        ),
        compiler_params=pltpu.CompilerParams(
            dimension_semantics=("parallel",),
            # ~4x tile (double-buffered in/out) + ~6x tile live intermediates;
            # 32 MiB is within the scoped limit on v5e/v6e/v7x.
            vmem_limit_bytes=32 << 20,
        ),
    )(wb, xp)

    out = out.reshape(B, C, HWp)
    if HWp != HW:
        out = out[..., :HW]
    return out.reshape(B, C, H, W)


def _reference(x, weight, bias, act=True, activation="relu"):
    """Pure-JAX reference mirroring the PyTorch forward."""
    B, C, H, W = x.shape
    sum_layer = jnp.max(x, axis=1, keepdims=True)                 # (B,1,H,W)
    xr = x.reshape(B * C, 1, H, W)
    w = weight.reshape(1, 1, 3, 3)
    y = jax.lax.conv_general_dilated(
        xr, w, window_strides=(1, 1), padding=((1, 1), (1, 1)),
        dimension_numbers=("NCHW", "OIHW", "NCHW"),
        precision=jax.lax.Precision.HIGHEST)
    y = y + bias[0]
    y = y.reshape(B, C, H, W) + sum_layer
    if act:
        if activation == "relu":
            y = jnp.maximum(y, 0.0)
        elif activation == "lrelu":
            y = jnp.where(y > 0, y, 0.01 * y)
        elif activation == "tanh":
            y = jnp.tanh(y)
    return y


if __name__ == "__main__":
    key = jax.random.PRNGKey(0)
    k_x, k_w, k_b = jax.random.split(key, 3)

    B, C, H, W = 2, 4, 16, 16
    x = jax.random.normal(k_x, (B, C, H, W), dtype=jnp.float32)

    # Deterministic Conv2d(1,1,3,3) parameter init (kaiming-uniform style bound)
    fan_in = 1 * 3 * 3
    bound = 1.0 / np.sqrt(fan_in)
    weight = jax.random.uniform(k_w, (3, 3), minval=-bound, maxval=bound,
                                dtype=jnp.float32)
    bias = jax.random.uniform(k_b, (1,), minval=-bound, maxval=bound,
                              dtype=jnp.float32)

    out = bottleneck_block(x, weight, bias, act=True)
    out = jax.block_until_ready(out)

    ref = _reference(x, weight, bias, act=True)
    np.testing.assert_allclose(np.asarray(out), np.asarray(ref),
                               rtol=1e-5, atol=1e-5)
    print("KERNEL_OK")
</pallas_src>

<mosaic_0001>
module attributes {stable_mosaic.version = 11 : i64} {
  func.func @_bottleneck_kernel(%arg0: i32, %arg1: memref<10xf32, #tpu.memory_space<smem>>, %arg2: memref<1x8x256xf32, #tpu.memory_space<vmem>>, %arg3: memref<1x8x256xf32, #tpu.memory_space<vmem>>) attributes {dimension_semantics = [#tpu.dimension_semantics<parallel>], iteration_bounds = array<i64: 1>, scalar_prefetch = 1 : i64, scratch_operands = 0 : i64, tpu.core_type = #tpu.core_type<tc>, window_params = [{transform_indices = @transform_0, window_bounds = array<i64: 1, 8, 256>}, {transform_indices = @transform_1, window_bounds = array<i64: 1, 8, 256>}]} {
    %c0 = arith.constant 0 : index
    %0 = memref.load %arg1[%c0] : memref<10xf32, #tpu.memory_space<smem>>
    %c1 = arith.constant 1 : index
    %1 = memref.load %arg1[%c1] : memref<10xf32, #tpu.memory_space<smem>>
    %c2 = arith.constant 2 : index
    %2 = memref.load %arg1[%c2] : memref<10xf32, #tpu.memory_space<smem>>
    %c3 = arith.constant 3 : index
    %3 = memref.load %arg1[%c3] : memref<10xf32, #tpu.memory_space<smem>>
    %c4 = arith.constant 4 : index
    %4 = memref.load %arg1[%c4] : memref<10xf32, #tpu.memory_space<smem>>
    %c5 = arith.constant 5 : index
    %5 = memref.load %arg1[%c5] : memref<10xf32, #tpu.memory_space<smem>>
    %c6 = arith.constant 6 : index
    %6 = memref.load %arg1[%c6] : memref<10xf32, #tpu.memory_space<smem>>
    %c7 = arith.constant 7 : index
    %7 = memref.load %arg1[%c7] : memref<10xf32, #tpu.memory_space<smem>>
    %c8 = arith.constant 8 : index
    %8 = memref.load %arg1[%c8] : memref<10xf32, #tpu.memory_space<smem>>
    %c9 = arith.constant 9 : index
    %9 = memref.load %arg1[%c9] : memref<10xf32, #tpu.memory_space<smem>>
    %c0_0 = arith.constant 0 : index
    %c0_1 = arith.constant 0 : index
    %c0_2 = arith.constant 0 : index
    %10 = vector.load %arg2[%c0_0, %c0_1, %c0_2] : memref<1x8x256xf32, #tpu.memory_space<vmem>>, vector<1x8x256xf32>
    %11 = tpu.iota {dimensions = array<i32: 2>} : vector<1x1x256xi32>
    %c16_i32 = arith.constant 16 : i32
    %c0_i32 = arith.constant 0 : i32
    %12 = arith.cmpi eq, %c16_i32, %c0_i32 : i32
    %c1_i32 = arith.constant 1 : i32
    %13 = arith.select %12, %c1_i32, %c16_i32 : i32
    %14 = vector.broadcast %13 : i32 to vector<1x1x256xi32>
    %15 = arith.remsi %11, %14 : vector<1x1x256xi32>
    %c0_i32_3 = arith.constant 0 : i32
    %16 = vector.broadcast %c0_i32_3 : i32 to vector<1x1x256xi32>
    %17 = arith.cmpi ne, %15, %16 : vector<1x1x256xi32>
    %c0_i32_4 = arith.constant 0 : i32
    %18 = vector.broadcast %c0_i32_4 : i32 to vector<1x1x256xi32>
    %19 = arith.cmpi slt, %15, %18 : vector<1x1x256xi32>
    %c0_i32_5 = arith.constant 0 : i32
    %20 = arith.cmpi slt, %13, %c0_i32_5 : i32
    %21 = vector.broadcast %20 : i1 to vector<1x1x256xi1>
    %22 = vector.broadcast %21 : vector<1x1x256xi1> to vector<1x1x256xi1>
    %23 = arith.xori %19, %22 : vector<1x1x256xi1>
    %24 = arith.andi %23, %17 : vector<1x1x256xi1>
    %25 = vector.broadcast %13 : i32 to vector<1x1x256xi32>
    %26 = arith.addi %15, %25 : vector<1x1x256xi32>
    %27 = arith.select %24, %26, %15 : vector<1x1x256xi1>, vector<1x1x256xi32>
    %c1_i32_6 = arith.constant 1 : i32
    %28 = vector.broadcast %c1_i32_6 : i32 to vector<1x1x256xi32>
    %29 = arith.cmpi sge, %27, %28 : vector<1x1x256xi32>
    %c14_i32 = arith.constant 14 : i32
    %30 = vector.broadcast %c14_i32 : i32 to vector<1x1x256xi32>
    %31 = arith.cmpi sle, %27, %30 : vector<1x1x256xi32>
    %c16_i32_7 = arith.constant 16 : i32
    %32 = vector.broadcast %c16_i32_7 : i32 to vector<1x1x256xi32>
    %33 = arith.cmpi sge, %11, %32 : vector<1x1x256xi32>
    %c240_i32 = arith.constant 240 : i32
    %34 = vector.broadcast %c240_i32 : i32 to vector<1x1x256xi32>
    %35 = arith.cmpi slt, %11, %34 : vector<1x1x256xi32>
    %c1_i32_8 = arith.constant 1 : i32
    %36 = tpu.dynamic_rotate %10 by %c1_i32_8 dim 2 : vector<1x8x256xf32>, i32 -> vector<1x8x256xf32>
    %cst = arith.constant 0.000000e+00 : f32
    %37 = vector.shape_cast %29 : vector<1x1x256xi1> to vector<1x1x256xi1>
    %38 = vector.broadcast %37 : vector<1x1x256xi1> to vector<1x8x256xi1>
    %39 = vector.broadcast %cst : f32 to vector<1x8x256xf32>
    %40 = arith.select %38, %36, %39 : vector<1x8x256xi1>, vector<1x8x256xf32>
    %c255_i32 = arith.constant 255 : i32
    %41 = tpu.dynamic_rotate %10 by %c255_i32 dim 2 : vector<1x8x256xf32>, i32 -> vector<1x8x256xf32>
    %cst_9 = arith.constant 0.000000e+00 : f32
    %42 = vector.shape_cast %31 : vector<1x1x256xi1> to vector<1x1x256xi1>
    %43 = vector.broadcast %42 : vector<1x1x256xi1> to vector<1x8x256xi1>
    %44 = vector.broadcast %cst_9 : f32 to vector<1x8x256xf32>
    %45 = arith.select %43, %41, %44 : vector<1x8x256xi1>, vector<1x8x256xf32>
    %46 = vector.broadcast %3 : f32 to vector<1x8x256xf32>
    %47 = arith.mulf %46, %40 : vector<1x8x256xf32>
    %48 = vector.broadcast %4 : f32 to vector<1x8x256xf32>
    %49 = arith.mulf %48, %10 : vector<1x8x256xf32>
    %50 = arith.addf %47, %49 : vector<1x8x256xf32>
    %51 = vector.broadcast %5 : f32 to vector<1x8x256xf32>
    %52 = arith.mulf %51, %45 : vector<1x8x256xf32>
    %53 = arith.addf %50, %52 : vector<1x8x256xf32>
    %54 = vector.broadcast %0 : f32 to vector<1x8x256xf32>
    %55 = arith.mulf %54, %40 : vector<1x8x256xf32>
    %56 = vector.broadcast %1 : f32 to vector<1x8x256xf32>
    %57 = arith.mulf %56, %10 : vector<1x8x256xf32>
    %58 = arith.addf %55, %57 : vector<1x8x256xf32>
    %59 = vector.broadcast %2 : f32 to vector<1x8x256xf32>
    %60 = arith.mulf %59, %45 : vector<1x8x256xf32>
    %61 = arith.addf %58, %60 : vector<1x8x256xf32>
    %c16_i32_10 = arith.constant 16 : i32
    %62 = tpu.dynamic_rotate %61 by %c16_i32_10 dim 2 : vector<1x8x256xf32>, i32 -> vector<1x8x256xf32>
    %cst_11 = arith.constant 0.000000e+00 : f32
    %63 = vector.shape_cast %33 : vector<1x1x256xi1> to vector<1x1x256xi1>
    %64 = vector.broadcast %63 : vector<1x1x256xi1> to vector<1x8x256xi1>
    %65 = vector.broadcast %cst_11 : f32 to vector<1x8x256xf32>
    %66 = arith.select %64, %62, %65 : vector<1x8x256xi1>, vector<1x8x256xf32>
    %67 = arith.addf %53, %66 : vector<1x8x256xf32>
    %68 = vector.broadcast %6 : f32 to vector<1x8x256xf32>
    %69 = arith.mulf %68, %40 : vector<1x8x256xf32>
    %70 = vector.broadcast %7 : f32 to vector<1x8x256xf32>
    %71 = arith.mulf %70, %10 : vector<1x8x256xf32>
    %72 = arith.addf %69, %71 : vector<1x8x256xf32>
    %73 = vector.broadcast %8 : f32 to vector<1x8x256xf32>
    %74 = arith.mulf %73, %45 : vector<1x8x256xf32>
    %75 = arith.addf %72, %74 : vector<1x8x256xf32>
    %c240_i32_12 = arith.constant 240 : i32
    %76 = tpu.dynamic_rotate %75 by %c240_i32_12 dim 2 : vector<1x8x256xf32>, i32 -> vector<1x8x256xf32>
    %cst_13 = arith.constant 0.000000e+00 : f32
    %77 = vector.shape_cast %35 : vector<1x1x256xi1> to vector<1x1x256xi1>
    %78 = vector.broadcast %77 : vector<1x1x256xi1> to vector<1x8x256xi1>
    %79 = vector.broadcast %cst_13 : f32 to vector<1x8x256xf32>
    %80 = arith.select %78, %76, %79 : vector<1x8x256xi1>, vector<1x8x256xf32>
    %81 = arith.addf %67, %80 : vector<1x8x256xf32>
    %82 = vector.extract_strided_slice %10 {offsets = [0, 0, 0], sizes = [1, 4, 256], strides = [1, 1, 1]} : vector<1x8x256xf32> to vector<1x4x256xf32>
    %cst_14 = arith.constant dense<0xFF800000> : vector<1x256xf32>
    %83 = vector.multi_reduction <maximumf>, %82, %cst_14 [1] : vector<1x4x256xf32> to vector<1x256xf32>
    %84 = vector.shape_cast %83 : vector<1x256xf32> to vector<1x1x256xf32>
    %85 = vector.broadcast %9 : f32 to vector<1x1x256xf32>
    %86 = arith.addf %84, %85 : vector<1x1x256xf32>
    %87 = vector.shape_cast %86 : vector<1x1x256xf32> to vector<1x1x256xf32>
    %88 = vector.broadcast %87 : vector<1x1x256xf32> to vector<1x4x256xf32>
    %89 = vector.extract_strided_slice %10 {offsets = [0, 4, 0], sizes = [1, 4, 256], strides = [1, 1, 1]} : vector<1x8x256xf32> to vector<1x4x256xf32>
    %cst_15 = arith.constant dense<0xFF800000> : vector<1x256xf32>
    %90 = vector.multi_reduction <maximumf>, %89, %cst_15 [1] : vector<1x4x256xf32> to vector<1x256xf32>
    %91 = vector.shape_cast %90 : vector<1x256xf32> to vector<1x1x256xf32>
    %92 = vector.broadcast %9 : f32 to vector<1x1x256xf32>
    %93 = arith.addf %91, %92 : vector<1x1x256xf32>
    %94 = vector.shape_cast %93 : vector<1x1x256xf32> to vector<1x1x256xf32>
    %95 = vector.broadcast %94 : vector<1x1x256xf32> to vector<1x4x256xf32>
    %96 = tpu.concatenate %88, %95 in 1 : vector<1x4x256xf32>, vector<1x4x256xf32> -> vector<1x8x256xf32>
    %97 = arith.addf %81, %96 : vector<1x8x256xf32>
    %cst_16 = arith.constant 0.000000e+00 : f32
    %98 = vector.broadcast %cst_16 : f32 to vector<1x8x256xf32>
    %99 = arith.maximumf %97, %98 : vector<1x8x256xf32>
    %c0_17 = arith.constant 0 : index
    %c0_18 = arith.constant 0 : index
    %c0_19 = arith.constant 0 : index
    %100 = vector.load %arg3[%c0_17, %c0_18, %c0_19] : memref<1x8x256xf32, #tpu.memory_space<vmem>>, vector<1x8x256xf32>
    tpu.vector_store %arg3[%c0_17, %c0_18, %c0_19], %99 {strides = array<i32>} : memref<1x8x256xf32, #tpu.memory_space<vmem>>, vector<1x8x256xf32>,
    return
  }
  func.func @transform_0(%arg0: i32, %arg1: memref<10xf32, #tpu.memory_space<smem>>) -> (i32, i32, i32) {
    %c0_i32 = arith.constant 0 : i32
    %c0_i32_0 = arith.constant 0 : i32
    %c0_i32_1 = arith.constant 0 : i32
    return %arg0, %c0_i32, %c0_i32_0 : i32, i32, i32
  }
  func.func @transform_1(%arg0: i32, %arg1: memref<10xf32, #tpu.memory_space<smem>>) -> (i32, i32, i32) {
    %c0_i32 = arith.constant 0 : i32
    %c0_i32_0 = arith.constant 0 : i32
    %c0_i32_1 = arith.constant 0 : i32
    return %arg0, %c0_i32, %c0_i32_0 : i32, i32, i32
  }
}

</mosaic_0001>

<bundles_post_ra>
// kernel: tpu_custom_call.1
= control target key start
LH: loop header
LB: loop body
LE: loop exit
PB: predicated region body
PF: predicated region fallthrough
CT: control target
= control target key end

     0   :  { %s447_s0 = inlined_call_operand.hbm [shape: f32[10], index: 0, kind: input, shape index: {}]   ;;  %s448_s1 = inlined_call_operand.hbm [shape: f32[1,8,256], index: 1, kind: input, shape index: {}]   ;;  %s449_s2 = inlined_call_operand.hbm [shape: f32[1,8,256], index: 2, kind: output, shape index: {}]  }
   0x1   :  { %s242_s11 = scalar_lea.hbm %s447_s0, 16 }
   0x2   :  { %p243_p0 = scmp.ne.s32.totalorder %s447_s0, %s242_s11  ;;  %p246_p1 = scmp.lt.u32.totalorder %s242_s11, %s447_s0 }
   0x4   :  { %p248_p2 = pnand %p246_p1, %p243_p0 }
   0x6   :  { %251 = shalt.err (!%p248_p2)  }
   0x7   :  { %s302_s16 = smov [#allocation3]  }
   0x8   :  { %8 = dma.hbm_to_smem %s447_s0, 16, %s302_s16, [#allocation2] }
   0x9   :  { %296 = dma.done.wait [#allocation2], 16 }
   0xa   :  { %297 = vsyncadd [#allocation2], 4294967280 }
   0xb   :  { %10 = sfence }
   0xc   :  { %11 = vsyncpa [#allocation5], 0 }
   0xd   :  { %12 = vsyncpa [#allocation6], 0  ;;  %s303_s19 = smov [#allocation4]   ;;  %s252_s23 = scalar_lea.hbm %s448_s1, 256 }
   0xe   :  { %s19_s20 = sshll.u32 %s303_s19, 4  ;;  %p253_p3 = scmp.ne.s32.totalorder %s448_s1, %s252_s23  ;;  %s20_s20 = int_to_ptr.vmem [resolvable:$true] %s19_s20 }
   0xf   :  { %p256_p4 = scmp.lt.u32.totalorder %s252_s23, %s448_s1 }
  0x11   :  { %p258_p5 = pnand %p256_p4, %p253_p3 }
  0x13   :  { %261 = shalt.err (!%p258_p5)
}
  0x14   :  { %s262_s0 = scalar_lea.vmem %s20_s20, 256  ;;  %p267_p7 = scmp.lt.s32.totalorder %s20_s20, %s20_s20 }
  0x15   :  { %p263_p6 = scmp.ne.s32.totalorder %s20_s20, %s262_s0  ;;  %p268_p8 = scmp.lt.s32.totalorder %s262_s0, %s262_s0 }
  0x17   :  { %p269_p9 = por %p268_p8, %p267_p7 }
  0x19   :  { %p270_p10 = pnand %p269_p9, %p263_p6 }
  0x1b   :  { %273 = shalt.err (!%p270_p10)
}
  0x1c   :  { %22 = dma.hbm_to_vmem [thread:$0]  %s448_s1, 256, %s20_s20, [#allocation5]  }
  0x1d   :  { %298 = dma.done.wait [#allocation5], 256  }
  0x1e   :  { %299 = vsyncadd [#allocation5], 4294967040  ;;  %v348_v0 = vld [vmem:[#allocation4] sm:$0xff]  ;;  %s304_s30 = smov 127   ;;  %s305_s3 = smov 1   ;;  %v352_v1 = vld [vmem:[#allocation4 + $0x8] sm:$0xff]  ;;  %v38_v2 = vlaneseq }
  0x1f   :  { %86 = vrot.lane.b32.xlu1 %v348_v0, %s304_s30  ;;  %73 = vrot.lane.b32.xlu0 %v348_v0, %s305_s3  ;;  %s358_s1 = sld [smem:[#allocation3 + $0x4]]  ;;  %s360_s4 = sld [smem:[#allocation3 + $0x2]]  ;;  %vm168_vm6 = vcmask 1043456   ;;  %vm186_vm7 = vcmask 1047556  }
  0x20   :  { %v356_v3 = vand.u32 127, %v38_v2  ;;  %s362_s5 = sld [smem:[#allocation3 + $0x5]]  ;;  %s367_s6 = sld [smem:[#allocation3]]  ;;  %v169_v61 = vsel %vm168_vm6, %v348_v0, -inf  ;;  %v187_v62 = vsel %vm186_vm7, %v348_v0, -inf  ;;  %v176_v63 = vsel %vm168_vm6, %v352_v1, -inf }
  0x21   :  { %s369_s7 = sld [smem:[#allocation3 + $0x3]]  ;;  %s371_s8 = sld [smem:[#allocation3 + $0x1]]  ;;  %v194_v2 = vsel %vm186_vm7, %v352_v1, -inf }
  0x22   :  { %v365_v4 = vadd.s32 128, %v356_v3  ;;  %s373_s9 = sld [smem:[#allocation3 + $0x7]]  ;;  %v45_v5 = vand.u32 15, %v356_v3  ;;  %s376_s10 = sld [smem:[#allocation3 + $0x6]]  ;;  %vm90_vm0 = vcmp.lt.s32.totalorder %v356_v3, 127  ;;  %vm77_vm3 = vcmp.lt.s32.totalorder %v356_v3, 1 }
  0x23   :  { %88 = vrot.lane.b32.xlu1 %v352_v1, %s304_s30  ;;  %75 = vrot.lane.b32.xlu0 %v352_v1, %s305_s3  ;;  %s397_s11 = sld [smem:[#allocation3 + $0x8]]  ;;  %s306_s12 = smov 16   ;;  %vm129_vm8 = vcmp.lt.s32.totalorder %v356_v3, 16  ;;  %vm69_vm9 = vcmp.ge.s32.totalorder %v356_v3, 16  ;;  %vm157_vm10 = vcmp.lt.s32.totalorder %v356_v3, 112 }
  0x24   :  { %v52_v6 = vand.u32 15, %v365_v4  ;;  %vm381_vm1 = vcmp.le.s32.totalorder %v45_v5, 14  ;;  %vm386_vm2 = vcmp.ge.s32.totalorder %v45_v5, 1  ;;  %s307_s13 = smov 112   ;;  %v170_v5 = vrot.slane %v169_v61, 4  ;;  %s234_s14 = sld [smem:[#allocation3 + $0x9]] }
  0x25   :  { %v102_v9 = vstv %s358_s1  ;;  %v120_v14 = vstv %s360_s4  ;;  %vm72_vm11 = vcmp.lt.s32.totalorder %v365_v4, 240  ;;  %s308_s15 = smov [#allocation7]  }
  0x26   :  { %v107_v11 = vstv %s362_s5  ;;  %vm391_vm4 = vcmp.le.s32.totalorder %v52_v6, 14  ;;  %vm66_vm5 = vcmp.ge.s32.totalorder %v52_v6, 1  ;;  %v112_v15 = vstv %s367_s6  ;;  %s217_s16 = sshll.u32 %s308_s15, 4  ;;  %s218_s16 = int_to_ptr.vmem [resolvable:$true] %s217_s16 }
  0x27   :  { %v99_v18 = vstv %s369_s7  ;;  %v103_v19 = vmul.f32 %v102_v9, %v348_v0  ;;  %v115_v20 = vstv %s371_s8  ;;  %v104_v29 = vmul.f32 %v102_v9, %v352_v1  ;;  %s274_s17 = scalar_lea.vmem %s218_s16, 256  ;;  %p279_p12 = scmp.lt.s32.totalorder %s218_s16, %s218_s16 }
  0x28   :  { %v143_v21 = vstv %s373_s9  ;;  %v140_v28 = vstv %s376_s10  ;;  %v117_v32 = vmul.f32 %v115_v20, %v352_v1  ;;  %v116_v33 = vmul.f32 %v115_v20, %v348_v0  ;;  %p275_p11 = scmp.ne.s32.totalorder %s218_s16, %s274_s17  ;;  %p280_p13 = scmp.lt.s32.totalorder %s274_s17, %s274_s17 }
  0x29   :  { %v145_v36 = vmul.f32 %v143_v21, %v352_v1  ;;  %v144_v37 = vmul.f32 %v143_v21, %v348_v0  ;;  %v148_v50 = vstv %s397_s11  ;;  %v188_v6 = vrot.slane %v187_v62, 4 }
  0x2a   :  { %v171_v9 = vmax.f32 %v169_v61, %v170_v5  ;;  %p281_p0 = por %p280_p13, %p279_p12 }
  0x2b   :  { %v189_v10 = vmax.f32 %v187_v62, %v188_v6 }
  0x2c   :  { %v172_v13 = vrot.slane %v171_v9, 2  ;;  %p282_p1 = pnand %p281_p0, %p275_p11 }
  0x91   :  { %v87_v7 = vpop.permute.xlu1 %86  ;;  %v74_v8 = vpop.permute.xlu0 %73 }
  0x95   :  { %v89_v16 = vpop.permute.xlu1 %88  ;;  %v76_v17 = vpop.permute.xlu0 %75 }
  0x96   :  { %v91_v22 = vsel %vm90_vm0, %v87_v7, %v89_v16  ;;  %v92_v23 = vsel %vm90_vm0, %v89_v16, %v87_v7  ;;  %v78_v24 = vsel %vm77_vm3, %v74_v8, %v76_v17  ;;  %v79_v25 = vsel %vm77_vm3, %v76_v17, %v74_v8 }
  0x97   :  { %v84_v26 = vsel %vm386_vm2, %v79_v25, 0.0  ;;  %v85_v27 = vsel %vm66_vm5, %v78_v24, 0.0  ;;  %v97_v30 = vsel %vm381_vm1, %v91_v22, 0.0  ;;  %v98_v31 = vsel %vm391_vm4, %v92_v23, 0.0 }
  0x98   :  { %v100_v34 = vmul.f32 %v99_v18, %v84_v26  ;;  %v101_v35 = vmul.f32 %v99_v18, %v85_v27  ;;  %v113_v38 = vmul.f32 %v112_v15, %v84_v26  ;;  %v114_v39 = vmul.f32 %v112_v15, %v85_v27 }
  0x99   :  { %v141_v40 = vmul.f32 %v140_v28, %v84_v26  ;;  %v142_v41 = vmul.f32 %v140_v28, %v85_v27  ;;  %v108_v42 = vmul.f32 %v107_v11, %v97_v30  ;;  %v109_v43 = vmul.f32 %v107_v11, %v98_v31 }
  0x9a   :  { %v105_v44 = vadd.f32 %v103_v19, %v100_v34  ;;  %v106_v45 = vadd.f32 %v104_v29, %v101_v35  ;;  %v121_v46 = vmul.f32 %v120_v14, %v97_v30  ;;  %v122_v47 = vmul.f32 %v120_v14, %v98_v31 }
  0x9b   :  { %v119_v48 = vadd.f32 %v117_v32, %v114_v39  ;;  %v118_v49 = vadd.f32 %v116_v33, %v113_v38  ;;  %v147_v55 = vadd.f32 %v145_v36, %v142_v41  ;;  %v146_v56 = vadd.f32 %v144_v37, %v141_v40 }
  0x9c   :  { %v110_v51 = vadd.f32 %v108_v42, %v105_v44  ;;  %v420_v52 = vadd.f32 %v109_v43, %v106_v45  ;;  %v149_v57 = vmul.f32 %v148_v50, %v97_v30  ;;  %v150_v58 = vmul.f32 %v148_v50, %v98_v31 }
  0x9d   :  { %v124_v53 = vadd.f32 %v122_v47, %v119_v48  ;;  %v123_v54 = vadd.f32 %v121_v46, %v118_v49  ;;  %v177_v7 = vrot.slane %v176_v63, 4  ;;  %v195_v8 = vrot.slane %v194_v2, 4 }
  0x9e   :  { %v152_v59 = vadd.f32 %v150_v58, %v147_v55  ;;  %v151_v60 = vadd.f32 %v149_v57, %v146_v56  ;;  %v190_v14 = vrot.slane %v189_v10, 2  ;;  %v173_v17 = vmax.f32 %v171_v9, %v172_v13 }
  0x9f   :  { %127 = vrot.lane.b32.xlu1 %v124_v53, %s306_s12  ;;  %125 = vrot.lane.b32.xlu0 %v123_v54, %s306_s12  ;;  %v178_v11 = vmax.f32 %v176_v63, %v177_v7  ;;  %v196_v12 = vmax.f32 %v194_v2, %v195_v8  ;;  %v183_v26 = vstv %s234_s14 }
  0xa0   :  { %v191_v18 = vmax.f32 %v189_v10, %v190_v14  ;;  %v174_v20 = vrot.slane %v173_v17, 1 }
  0xa1   :  { %v179_v15 = vrot.slane %v178_v11, 2  ;;  %v197_v16 = vrot.slane %v196_v12, 2 }
  0xa2   :  { %v192_v21 = vrot.slane %v191_v18, 1  ;;  %v175_v23 = vmax.f32 %v173_v17, %v174_v20 }
  0xa3   :  { %155 = vrot.lane.b32.xlu1 %v152_v59, %s307_s13  ;;  %153 = vrot.lane.b32.xlu0 %v151_v60, %s307_s13  ;;  %v180_v0 = vmax.f32 %v178_v11, %v179_v15  ;;  %v198_v19 = vmax.f32 %v196_v12, %v197_v16 }
  0xa4   :  { %v193_v24 = vmax.f32 %v191_v18, %v192_v21  ;;  %v184_v31 = vadd.f32 %v183_v26, %v175_v23 }
  0xa5   :  { %v181_v1 = vrot.slane %v180_v0, 1  ;;  %v199_v22 = vrot.slane %v198_v19, 1 }
  0xa6   :  { %v201_v32 = vadd.f32 %v193_v24, %v183_v26 }
  0xa7   :  { %v182_v25 = vmax.f32 %v180_v0, %v181_v1  ;;  %v200_v27 = vmax.f32 %v198_v19, %v199_v22 }
  0xa8   :  { %v203_v41 = vsel %vm168_vm6, %v184_v31, %v201_v32 }
  0xa9   :  { %v185_v35 = vadd.f32 %v183_v26, %v182_v25  ;;  %v202_v36 = vadd.f32 %v200_v27, %v183_v26 }
  0xab   :  { %v204_v44 = vsel %vm168_vm6, %v185_v35, %v202_v36 }
 0x111   :  { %v128_v28 = vpop.permute.xlu1 %127  ;;  %v126_v29 = vpop.permute.xlu0 %125 }
 0x112   :  { %v131_v30 = vsel %vm129_vm8, %v128_v28, %v126_v29  ;;  %v130_v33 = vsel %vm129_vm8, %v126_v29, %v128_v28 }
 0x113   :  { %v136_v34 = vsel %vm69_vm9, %v131_v30, 0.0  ;;  %v139_v40 = vadd.f32 %v130_v33, %v420_v52 }
 0x114   :  { %v138_v37 = vadd.f32 %v136_v34, %v110_v51 }
 0x115   :  { %v156_v38 = vpop.permute.xlu1 %155  ;;  %v154_v39 = vpop.permute.xlu0 %153 }
 0x116   :  { %v158_v42 = vsel %vm157_vm10, %v154_v39, %v156_v38  ;;  %v159_v43 = vsel %vm157_vm10, %v156_v38, %v154_v39 }
 0x117   :  { %v165_v3 = vsel %vm72_vm11, %v159_v43, 0.0  ;;  %v166_v45 = vadd.f32 %v158_v42, %v138_v37 }
 0x118   :  { %v167_v46 = vadd.f32 %v165_v3, %v139_v40 }
 0x119   :  { %v205_v47 = vadd.f32 %v203_v41, %v166_v45 }
 0x11a   :  { %v206_v48 = vadd.f32 %v204_v44, %v167_v46 }
 0x11b   :  { %v207_v49 = vmax.f32 %v205_v47, 0.0 }
 0x11c   :  { %v208_v50 = vmax.f32 %v206_v48, 0.0 }
 0x11d   :  { %209 = vst [vmem:[#allocation7] sm:$0xff] %v207_v49 }
 0x11e   :  { %210 = vst [vmem:[#allocation7 + $0x8] sm:$0xff] %v208_v50 }
 0x11f   :  { %285 = shalt.err (!%p282_p1)
}
 0x120   :  { %s286_s20 = scalar_lea.hbm %s449_s2, 256 }
 0x121   :  { %p287_p2 = scmp.ne.s32.totalorder %s449_s2, %s286_s20  ;;  %p290_p3 = scmp.lt.u32.totalorder %s286_s20, %s449_s2 }
 0x123   :  { %p292_p4 = pnand %p290_p3, %p287_p2 }
 0x125   :  { %295 = shalt.err (!%p292_p4)
}
 0x126   :  { %220 = dma.vmem_to_hbm [thread:$0]  %s218_s16, 256, %s449_s2, [#allocation6]  }
 0x127   :  { %300 = dma.done.wait [#allocation6], 256  }
 0x128   :  { %301 = vsyncadd [#allocation6], 4294967040 }
 0x129   :  { %224 = vsyncpa [#allocation5], 1 }
 0x12a   :  { %225 = vsyncpa [#allocation6], 1 }

</bundles_post_ra>
